<compile_context>
chip_gen: v6e
topology: v6e:2x2x1
jax: 0.10.0
libtpu: 0.0.40
codegen_flags: <defaults>
</compile_context>

<pallas_src>
import jax
import jax.numpy as jnp
from jax.experimental import pallas as pl
from jax.experimental.pallas import tpu as pltpu


def _wlp_kernel(w_ref, x_ref, o_ref):
    """grid = (row_tiles, L); layer axis (axis 1) is the innermost reduction."""
    l = pl.program_id(1)

    @pl.when(l == 0)
    def _():
        o_ref[...] = jnp.zeros_like(o_ref)

    # Weighted accumulation directly into the resident f32 output tile.
    o_ref[...] += w_ref[l] * x_ref[...].astype(o_ref.dtype)


def weighted_layer_pooling(features, layer_weights, layer_start=4):
    """features: [num_layers+1, B, S, H]; layer_weights: [num_layers+1-layer_start]."""
    x = features[layer_start:]                            # [L, B, S, H]
    L, B, S, H = x.shape
    out_dtype = jnp.promote_types(x.dtype, jnp.float32)   # matches torch promotion

    # Fold the final division into the weights.
    w = layer_weights.astype(jnp.float32)
    w = w / jnp.sum(w)

    # Lane-dense 2-D view of the (B, S, H) plane.
    N = B * S
    total = N * H
    if H % 128 == 0:
        R, C = N, H
        flat_pad = 0
        x2 = x.reshape(L, R, C)
    else:
        C = 128
        for cand in (2048, 1024, 512, 256, 128):
            if total % cand == 0:
                C = cand
                break
        flat_pad = (-total) % C
        xf = x.reshape(L, total)
        if flat_pad:
            xf = jnp.pad(xf, ((0, 0), (0, flat_pad)))
        R = (total + flat_pad) // C
        x2 = xf.reshape(L, R, C)

    # Row-tile size: ~2 MiB per input buffer, multiple of 8 sublanes.
    in_bytes = x2.dtype.itemsize
    target = (2 * 1024 * 1024) // max(1, C * in_bytes)
    target = max(256, min(2048, target))
    if R <= target:
        tm = R                                            # single tile == full dim
    else:
        tm = max(8, (target // 8) * 8)
    row_tiles = pl.cdiv(R, tm)

    # VMEM budget: double-buffered input + output tile, with headroom.
    out_bytes = jnp.dtype(out_dtype).itemsize
    tile_elems = tm * C
    vmem_need = 2 * tile_elems * in_bytes + 2 * tile_elems * out_bytes
    vmem_limit = int(min(64 * 1024 * 1024, max(32 * 1024 * 1024, 2 * vmem_need)))

    out = pl.pallas_call(
        _wlp_kernel,
        out_shape=jax.ShapeDtypeStruct((R, C), out_dtype),
        grid_spec=pltpu.PrefetchScalarGridSpec(
            num_scalar_prefetch=1,                        # normalized weights -> SMEM
            grid=(row_tiles, L),                          # layer (reduction) axis last
            in_specs=[
                # leading layer dim squeezed -> kernel sees a (tm, C) tile
                pl.BlockSpec((None, tm, C), lambda i, l, w_r: (l, i, 0)),
            ],
            out_specs=pl.BlockSpec((tm, C), lambda i, l, w_r: (i, 0)),
        ),
        compiler_params=pltpu.CompilerParams(
            dimension_semantics=("parallel", "arbitrary"),
            vmem_limit_bytes=vmem_limit,
        ),
    )(w, x2)

    if H % 128 == 0:
        return out.reshape(B, S, H)
    flat = out.reshape(-1)
    if flat_pad:
        flat = flat[:total]
    return flat.reshape(B, S, H)


if __name__ == "__main__":
    # Module config (small, synthetic): num_hidden_layers=6, layer_start=4.
    num_hidden_layers = 6
    layer_start = 4
    B, S, H = 2, 8, 32

    # Default layer_weights parameter: ones of length (num_hidden_layers+1-layer_start).
    layer_weights = jnp.ones((num_hidden_layers + 1 - layer_start,), dtype=jnp.float32)

    # Deterministic example input: stack of (num_hidden_layers + 1) layer outputs.
    key = jax.random.PRNGKey(0)
    features = jax.random.normal(
        key, (num_hidden_layers + 1, B, S, H), dtype=jnp.float32
    )

    out = weighted_layer_pooling(features, layer_weights, layer_start=layer_start)
    out = jax.block_until_ready(out)

    # Reference check in plain JAX (mirrors the PyTorch forward exactly).
    x = features[layer_start:]
    ref = (layer_weights[:, None, None, None] * x).sum(axis=0) / layer_weights.sum()
    assert out.shape == (B, S, H)
    assert jnp.allclose(out, ref, atol=1e-5, rtol=1e-5)

    print("KERNEL_OK")
</pallas_src>

<mosaic_0001>
module attributes {stable_mosaic.version = 11 : i64} {
  func.func @_wlp_kernel(%arg0: i32, %arg1: i32, %arg2: memref<3xf32, #tpu.memory_space<smem>>, %arg3: memref<1x1x512xf32, #tpu.memory_space<vmem>>, %arg4: memref<1x512xf32, #tpu.memory_space<vmem>>) attributes {dimension_semantics = [#tpu.dimension_semantics<parallel>, #tpu.dimension_semantics<arbitrary>], iteration_bounds = array<i64: 1, 3>, scalar_prefetch = 1 : i64, scratch_operands = 0 : i64, tpu.core_type = #tpu.core_type<tc>, window_params = [{transform_indices = @transform_0, window_bounds = array<i64: 1, 1, 512>}, {transform_indices = @transform_1, window_bounds = array<i64: 1, 512>}]} {
    %c0_i32 = arith.constant 0 : i32
    %0 = arith.cmpi eq, %arg1, %c0_i32 : i32
    %1 = arith.extui %0 : i1 to i32
    %c0_i32_0 = arith.constant 0 : i32
    %2 = arith.cmpi ne, %1, %c0_i32_0 : i32
    scf.if %2 {
      %cst = arith.constant 0.000000e+00 : f32
      %12 = vector.broadcast %cst : f32 to vector<1x512xf32>
      %c0_7 = arith.constant 0 : index
      %c0_8 = arith.constant 0 : index
      %13 = vector.load %arg4[%c0_7, %c0_8] : memref<1x512xf32, #tpu.memory_space<vmem>>, vector<1x512xf32>
      tpu.vector_store %arg4[%c0_7, %c0_8], %12 {strides = array<i32>} : memref<1x512xf32, #tpu.memory_space<vmem>>, vector<1x512xf32>,
    } else {
    }
    %c0 = arith.constant 0 : index
    %c0_1 = arith.constant 0 : index
    %3 = vector.load %arg4[%c0, %c0_1] : memref<1x512xf32, #tpu.memory_space<vmem>>, vector<1x512xf32>
    %4 = arith.index_cast %arg1 : i32 to index
    %5 = memref.load %arg2[%4] : memref<3xf32, #tpu.memory_space<smem>>
    %c0_2 = arith.constant 0 : index
    %c0_3 = arith.constant 0 : index
    %c0_4 = arith.constant 0 : index
    %6 = vector.load %arg3[%c0_2, %c0_3, %c0_4] : memref<1x1x512xf32, #tpu.memory_space<vmem>>, vector<1x1x512xf32>
    %7 = vector.shape_cast %6 : vector<1x1x512xf32> to vector<1x512xf32>
    %8 = vector.broadcast %5 : f32 to vector<1x512xf32>
    %9 = arith.mulf %8, %7 : vector<1x512xf32>
    %10 = arith.addf %3, %9 : vector<1x512xf32>
    %c0_5 = arith.constant 0 : index
    %c0_6 = arith.constant 0 : index
    %11 = vector.load %arg4[%c0_5, %c0_6] : memref<1x512xf32, #tpu.memory_space<vmem>>, vector<1x512xf32>
    tpu.vector_store %arg4[%c0_5, %c0_6], %10 {strides = array<i32>} : memref<1x512xf32, #tpu.memory_space<vmem>>, vector<1x512xf32>,
    return
  }
  func.func @transform_0(%arg0: i32, %arg1: i32, %arg2: memref<3xf32, #tpu.memory_space<smem>>) -> (i32, i32, i32) {
    %c0_i32 = arith.constant 0 : i32
    %c0_i32_0 = arith.constant 0 : i32
    return %arg1, %arg0, %c0_i32 : i32, i32, i32
  }
  func.func @transform_1(%arg0: i32, %arg1: i32, %arg2: memref<3xf32, #tpu.memory_space<smem>>) -> (i32, i32) {
    %c0_i32 = arith.constant 0 : i32
    %c0_i32_0 = arith.constant 0 : i32
    return %arg0, %c0_i32 : i32, i32
  }
}

</mosaic_0001>

<bundles_post_ra>
// kernel: tpu_custom_call.1
= control target key start
LH: loop header
LB: loop body
LE: loop exit
PB: predicated region body
PF: predicated region fallthrough
CT: control target
= control target key end

     0   :  { %s437_s9 = smov [#allocation3]   ;;  %s575_s0 = inlined_call_operand.hbm [shape: f32[3], index: 0, kind: input, shape index: {}]   ;;  %s576_s1 = inlined_call_operand.hbm [shape: f32[3,1,512], index: 1, kind: input, shape index: {}]   ;;  %s577_s2 = inlined_call_operand.hbm [shape: f32[1,512], index: 2, kind: output, shape index: {}]  }
   0x1   :  { %8 = dma.hbm_to_smem %s575_s0, 16, %s437_s9, [#allocation2] }
   0x2   :  { %403 = dma.done.wait [#allocation2], 16 }
   0x3   :  { %404 = vsyncadd [#allocation2], 4294967280 }
   0x4   :  { %10 = sfence }
   0x5   :  { %11 = vsyncpa [#allocation5], 0 }
   0x6   :  { %13 = vsyncpa [#allocation5 + $0x1], 0 }
   0x7   :  { %14 = vsyncpa [#allocation6], 0  ;;  %s459_s12 = smov 0   ;;  %s461_s13 = smov 0  }
   0x8   :  { %s463_s14 = smov 0   ;;  %s465_s15 = smov 0  }
   0x9   :  { %s467_s16 = smov 0   ;;  %s469_s17 = smov 0  }
   0xa LB: > { %s241_s0 = sadd.s32 4294967295, %s435_s17   ;;  %s29_s18 = sadd.s32 1, %s431_s16  ;;  %s435_s17 = sphi %s469_s17, %s20_s17   ;;  %s431_s16 = sphi %s467_s16, %s586_s16   ;;  %s427_s15 = sphi %s465_s15, %s585_s15   ;;  %s423_s14 = sphi %s463_s14, %s584_s14   ;;  %s419_s13 = sphi %s461_s13, %s583_s13   ;;  %s415_s12 = sphi %s459_s12, %s582_s12  }
   0xb   : > { %p30_p0 = scmp.ge.s32.totalorder %s29_s18, 3  ;;  %s41_s19 = sadd.s32 1, %s423_s14 }
   0xc   : > { %p48_p1 = scmp.ne.s32.totalorder %s423_s14, %s419_s13  ;;  %p49_p2 = scmp.eq.s32.totalorder %s435_s17, 0 }
   0xd   : > { %s588_s18 = smov (%p30_p0, %s29_s18), 0  ;;  %p54_p4 = scmp.ne.s32.totalorder %s419_s13, %s415_s12 }
   0xe   : > { %p495_p3 = por %p49_p2, %p48_p1  ;;  %s36_s21 = ssub.s32 %s431_s16, %s588_s18 }
   0xf   : > { %p55_p5 = scmp.eq.s32.totalorder %s241_s0, 0  ;;  %p39_p6 = scmp.eq.s32.totalorder %s36_s21, 0 }
  0x10   : > { %p265_p8 = scmp.lt.s32.totalorder %s435_s17, 3  ;;  %s104_s24 = sand.u32 1, %s423_s14  }
  0x11   : > { %p504_p7 = por %p55_p5, %p54_p4  ;;  %s254_s25 = sshll.u32 %s431_s16, 6 }
  0x12   : > { %s510_s23 = scalar_select %p39_p6, %s423_s14, %s41_s19  }
  0x13   : > { %s244_s26 = sshll.u32 %s104_s24, 2  ;;  %s116_s29 = scalar_lea.hbm %s576_s1, %s254_s25 }
  0x14   : > { %s108_s30 = scalar_lea.vmem [#allocation4], %s244_s26  ;;  %p519_p9 = pnand %p265_p8, %p495_p3 }
  0x15   : > { %s118_s3 = sshll.u32 %s108_s30, 4  ;;  %p247_p10 = scmp.ge.s32.totalorder %s435_s17, 1  ;;  %s119_s3 = int_to_ptr.vmem [resolvable:$true] %s118_s3 }
  0x16   : > { %p123_p11 = scmp.lt.s32.totalorder %s435_s17, 4  ;;  %s105_s5 = scalar_lea.sflag [#allocation5], %s104_s24 }
  0x17   : > { %p329_p12 = pneg %p519_p9  ;;  %s340_s6 = scalar_lea.vmem %s119_s3, 64 }
  0x18   : > { %p341_p13 = scmp.ne.s32.totalorder %s119_s3, %s340_s6  ;;  %s438_s7 = smov [#allocation4]  }
  0x19   : > { %s345_s8 = sshll.u32 %s438_s7, 4  ;;  %s346_s8 = int_to_ptr.vmem [resolvable:$false] %s345_s8 }
  0x1a   : > { %p343_p0 = pnand %p341_p13, %p329_p12  ;;  %s347_s9 = scalar_lea.vmem %s346_s8, 128 }
  0x1b   : > { %p348_p2 = scmp.lt.s32.totalorder %s119_s3, %s346_s8  ;;  %p349_p3 = scmp.lt.s32.totalorder %s347_s9, %s340_s6 }
  0x1c   : > { %p344_p1 = pneg %p343_p0 }
  0x1d   : > { %p350_p4 = por %p349_p3, %p348_p2 }
  0x1f   : > { %p351_p5 = pnand %p350_p4, %p344_p1 }
  0x21   : > { %354 = shalt.err (!%p351_p5)
}
  0x22   : > { %264 = dma.hbm_to_vmem [thread:$0]  (!%p519_p9), %s116_s29, 64, %s119_s3, %s105_s5  }
  0x23   : > { %p124_p6 = pnand %p247_p10, %p123_p11 }
  0x24   : > { %s129_s10 = sand.u32 (!%p124_p6), 1, %s419_s13  }
  0x25   : > { %127 = sbr.rel (%p124_p6) target bundleno = 70 (0x46), region = 24  ;;  %s248_s11 = sshll.u32 (!%p124_p6), %s129_s10, 2 }
  0x26   : > { %s130_s12 = scalar_lea.sflag (!%p124_p6), [#allocation5], %s129_s10  ;;  %s133_s19 = scalar_lea.vmem (!%p124_p6), [#allocation4], %s248_s11 }
  0x2a   : > { %406 = dma.done.wait (%p504_p7), %s130_s12, 64  }
  0x2b   : > { %408 = vsyncadd (%p504_p7), %s130_s12, 4294967232  ;;  %p249_p8 = scmp.ne.s32.totalorder %s427_s15, 0 }
  0x2d   : > { %150 = sbr.rel (%p249_p8) target bundleno = 54 (0x36), region = 32 }
  0x32   : > { %v151_v0 = vlaneseq  ;;  %v439_v1 = vmov 0.0  }
  0x34   : > { %vm153_vm0 = vcmp.lt.s32.totalorder %v151_v0, 512 }
  0x35   : > { %155 = vst.msk [vmem:[#allocation7] sm:$0xf] %vm153_vm0, %v439_v1 }
  0x36 PF: > { %s157_s20 = sld [smem:[#allocation3 + %s427_s15]]  ;;  %v158_v2 = vld [vmem:[%s133_s19] sm:$0xf]  ;;  %v162_v3 = vlaneseq  ;;  %s440_s21 = smov [#allocation7]  }
  0x37   : > { %s177_s24 = sshll.u32 %s440_s21, 4  ;;  %p542_p7 = scmp.eq.s32.totalorder %s241_s0, 2  ;;  %s178_s24 = int_to_ptr.vmem [resolvable:$true] %s177_s24 }
  0x38   : > { %vm164_vm1 = vcmp.lt.s32.totalorder %v162_v3, 512  ;;  %s355_s25 = scalar_lea.vmem %s178_s24, 64  ;;  %p362_p12 = scmp.lt.s32.totalorder %s178_s24, %s178_s24 }
  0x39   : > { %p356_p9 = scmp.ne.s32.totalorder %s178_s24, %s355_s25  ;;  %p363_p13 = scmp.lt.s32.totalorder %s355_s25, %s355_s25 }
  0x3b   : > { %p357_p10 = pnand %p356_p9, %p542_p7  ;;  %p364_p0 = por %p363_p13, %p362_p12 }
  0x3c   : > { %v156_v4 = vld [vmem:[#allocation7] sm:$0xf]  ;;  %v159_v5 = vstv %s157_s20 }
  0x3d   : > { %v160_v6 = vmul.f32 %v159_v5, %v158_v2  ;;  %p358_p11 = pneg %p357_p10 }
  0x3f   : > { %v161_v7 = vadd.f32 %v160_v6, %v156_v4  ;;  %p365_p1 = pnand %p364_p0, %p358_p11 }
  0x41   : > { %166 = vst.msk [vmem:[#allocation7] sm:$0xf] %vm164_vm1, %v161_v7 }
  0x42   : > { %368 = shalt.err (!%p365_p1)
}
  0x43   : > { %258 = dma.vmem_to_hbm [thread:$0]  (%p542_p7), %s178_s24, 64, %s577_s2, [#allocation6]  }
  0x44   : > { %410 = dma.done.wait (%p542_p7), [#allocation6], 64  }
  0x45   : > { %412 = vsyncadd (%p542_p7), [#allocation6], 4294967232 }
  0x46 PF: > { %s20_s17 = sadd.s32 1, %s435_s17   ;;  %s582_s12 = smov %s419_s13 }
  0x47   : > { %p17_p2 = scmp.ge.s32.totalorder %s20_s17, 5   ;;  %s583_s13 = smov %s423_s14 }
  0x48   : > { %s584_s14 = smov %s510_s23  ;;  %s585_s15 = smov %s431_s16 }
  0x49   : > { %s586_s16 = smov %s588_s18  ;;  %19 = sbr.rel (!%p17_p2) target bundleno = 10 (0xa), region = 66 }
  0x4e   :  { %190 = vsyncpa [#allocation5], 1 }
  0x4f   :  { %192 = vsyncpa [#allocation5 + $0x1], 1 }
  0x50   :  { %193 = vsyncpa [#allocation6], 1 }
  0x51   :  { %195 = vsyncpa [#allocation6 + $0x1], 1 }

</bundles_post_ra>
